<compile_context>
chip_gen: v7x
topology: tpu7x:2x2x1
jax: 0.10.0
libtpu: 0.0.40
codegen_flags: <defaults>
</compile_context>

<pallas_src>
import functools

import jax
import jax.numpy as jnp
from jax.experimental import pallas as pl
from jax.experimental.pallas import tpu as pltpu

NEG_SLOPE = 0.2  # GATv2Conv default negative_slope
# leaky_relu(z, 0.2) == LIN_C * z + ABS_C * |z|
LIN_C = (1.0 + NEG_SLOPE) / 2.0   # 0.6
ABS_C = (1.0 - NEG_SLOPE) / 2.0   # 0.4


def gat_imputer_kernel(scal_ref,          # SMEM [2*hidden + 2] : att1, att2, lo, hi
                       x_ref,             # VMEM [N, d]
                       adjb_ref,          # VMEM [N, N] additive mask (0 / -1e30)
                       w1_ref,            # VMEM [d, 2*hidden]      (wl1 || wr1)
                       w2_ref,            # VMEM [hidden, 2*hidden] (wl2 || wr2)
                       wout_ref,          # VMEM [hidden, d]
                       vecs_ref,          # VMEM [8, D] packed bias rows
                       y_ref,             # VMEM [N, d]
                       *, hidden, d):
    x = x_ref[...]
    adjb = adjb_ref[...]
    vecs = vecs_ref[...]

    bl1 = vecs[0:1, :hidden]
    br1 = vecs[1:2, :hidden]
    b1 = vecs[2:3, :hidden]
    bl2 = vecs[3:4, :hidden]
    br2 = vecs[4:5, :hidden]
    b2 = vecs[5:6, :hidden]
    bout = vecs[6:7, :d]

    def gatv2_layer(h, w_ref, bl, br, b, att_off):
        n = h.shape[0]
        # one fused MXU matmul for both linear transforms
        g = jnp.dot(h, w_ref[...], preferred_element_type=jnp.float32)  # [N, 2*hidden]
        gl = g[:, :hidden] + bl   # source transform
        gr = g[:, hidden:] + br   # target transform
        glT = gl.T                # hoisted transpose: [hidden, N] (sources on lanes)

        # s[i, j] = sum_c att_c * leaky_relu(gl[j, c] + gr[i, c])
        #         = lin_col[i] + lin_row[j] + sum_c (ABS_C*att_c) * |gl[j,c] + gr[i,c]|
        # Static loop over the tiny hidden dim; only the abs term is full [N, N] work.
        s_abs = jnp.zeros((n, n), dtype=jnp.float32)
        lin_row = jnp.zeros((1, n), dtype=jnp.float32)   # per-source score (lanes)
        lin_col = jnp.zeros((n, 1), dtype=jnp.float32)   # per-target score (sublanes)
        for c in range(hidden):
            a = scal_ref[att_off + c]
            glc = glT[c:c + 1, :]                        # [1, N]
            grc = gr[:, c:c + 1]                         # [N, 1]
            s_abs = s_abs + (ABS_C * a) * jnp.abs(grc + glc)
            lin_row = lin_row + (LIN_C * a) * glc
            lin_col = lin_col + (LIN_C * a) * grc
        s = lin_col + lin_row + s_abs + adjb             # masked scores [N_tgt, N_src]

        # softmax over incoming neighbours (lane-axis reduction)
        s = s - jnp.max(s, axis=-1, keepdims=True)
        p = jnp.exp(s)
        inv = pl.reciprocal(jnp.sum(p, axis=-1, keepdims=True), approx=True)
        alpha = p * inv
        return jnp.dot(alpha, gl, preferred_element_type=jnp.float32) + b

    h1 = jnp.maximum(gatv2_layer(x, w1_ref, bl1, br1, b1, 0), 0.0)
    h2 = jnp.maximum(gatv2_layer(h1, w2_ref, bl2, br2, b2, hidden), 0.0)

    logits = jnp.dot(h2, wout_ref[...], preferred_element_type=jnp.float32) + bout
    y = jax.nn.sigmoid(logits)

    # fused optional min_max rescale (lo=0, hi=1 -> identity)
    lo = scal_ref[2 * hidden]
    hi = scal_ref[2 * hidden + 1]
    y_ref[...] = (y * (hi - lo) + lo).astype(y_ref.dtype)


def _glorot(key, shape):
    fan_in, fan_out = shape[0], shape[-1]
    limit = (6.0 / (fan_in + fan_out)) ** 0.5
    return jax.random.uniform(key, shape, jnp.float32, -limit, limit)


def init_gat_imputer_params(key, d, num_heads=1):
    assert num_heads == 1, "kernel implements the module default num_heads=1"
    hidden = max(int(d ** 0.5), 3)
    ks = jax.random.split(key, 8)
    params = dict(
        # conv1: GATv2Conv(d -> hidden)
        wl1=_glorot(ks[0], (d, hidden)),
        wr1=_glorot(ks[1], (d, hidden)),
        bl1=jnp.zeros((1, hidden), jnp.float32),
        br1=jnp.zeros((1, hidden), jnp.float32),
        att1=_glorot(ks[2], (1, hidden)),
        b1=jnp.zeros((1, hidden), jnp.float32),
        # conv2: GATv2Conv(hidden -> hidden)
        wl2=_glorot(ks[3], (hidden, hidden)),
        wr2=_glorot(ks[4], (hidden, hidden)),
        bl2=jnp.zeros((1, hidden), jnp.float32),
        br2=jnp.zeros((1, hidden), jnp.float32),
        att2=_glorot(ks[5], (1, hidden)),
        b2=jnp.zeros((1, hidden), jnp.float32),
        # out: Linear(hidden -> d), stored transposed for x @ W
        wout=_glorot(ks[6], (hidden, d)),
        bout=0.01 * _glorot(ks[7], (1, d)),
    )
    return params, hidden


def gat_imputer_forward(x, edge_index, params, min_max=None):
    """x: [N, d] float32; edge_index: [2, E] int32 (row0 = source, row1 = target)."""
    n, d = x.shape
    hidden = params["wl1"].shape[1]

    # dense adjacency additive bias [target, source] with self loops (PyG add_self_loops=True)
    src = edge_index[0]
    dst = edge_index[1]
    adj = jnp.zeros((n, n), jnp.float32).at[dst, src].set(1.0)
    adj = jnp.maximum(adj, jnp.eye(n, dtype=jnp.float32))
    adj_bias = jnp.where(adj > 0, 0.0, -1e30).astype(jnp.float32)

    # fuse wl||wr per layer (one matmul per layer inside the kernel)
    w1 = jnp.concatenate([params["wl1"], params["wr1"]], axis=1)   # [d, 2*hidden]
    w2 = jnp.concatenate([params["wl2"], params["wr2"]], axis=1)   # [hidden, 2*hidden]
    wout = params["wout"]

    # pack all small bias rows into one VMEM array [8, D]
    D = max(hidden, d)

    def pad_row(v):
        v = v.reshape(1, -1)
        return jnp.pad(v, ((0, 0), (0, D - v.shape[-1])))

    vecs = jnp.concatenate([
        pad_row(params["bl1"]), pad_row(params["br1"]), pad_row(params["b1"]),
        pad_row(params["bl2"]), pad_row(params["br2"]), pad_row(params["b2"]),
        pad_row(params["bout"]), jnp.zeros((1, D), jnp.float32),
    ], axis=0)

    # pack att1, att2 and the (optional) min_max scalars into one SMEM array
    if min_max is None:
        lo, hi = 0.0, 1.0
    else:
        lo, hi = min_max
    scal = jnp.concatenate([
        params["att1"].reshape(-1).astype(jnp.float32),
        params["att2"].reshape(-1).astype(jnp.float32),
        jnp.array([lo, hi], jnp.float32),
    ])

    vmem = pl.BlockSpec(memory_space=pltpu.MemorySpace.VMEM)
    smem = pl.BlockSpec(memory_space=pltpu.MemorySpace.SMEM)

    kernel = functools.partial(gat_imputer_kernel, hidden=hidden, d=d)
    y = pl.pallas_call(
        kernel,
        out_shape=jax.ShapeDtypeStruct((n, d), jnp.float32),
        in_specs=[smem, vmem, vmem, vmem, vmem, vmem, vmem],
        out_specs=vmem,
    )(scal, x, adj_bias, w1, w2, wout, vecs)
    return y


if __name__ == "__main__":
    key = jax.random.PRNGKey(0)
    k_x, k_p = jax.random.split(key)

    d = 16          # feature dim -> hidden_dim = max(int(16**0.5), 3) = 4
    n_nodes = 12

    x = jax.random.uniform(k_x, (n_nodes, d), jnp.float32)

    # small bidirectional ring graph
    idx = jnp.arange(n_nodes, dtype=jnp.int32)
    nxt = (idx + 1) % n_nodes
    edge_index = jnp.stack([jnp.concatenate([idx, nxt]),
                            jnp.concatenate([nxt, idx])])  # [2, 24]

    params, hidden = init_gat_imputer_params(k_p, d)

    fwd = jax.jit(functools.partial(gat_imputer_forward, min_max=None))
    y = fwd(x, edge_index, params)
    jax.block_until_ready(y)

    assert y.shape == (n_nodes, d)
    assert bool(jnp.all(jnp.isfinite(y)))
    assert bool(jnp.all((y >= 0.0) & (y <= 1.0)))  # sigmoid output range
    print("KERNEL_OK")
</pallas_src>

<mosaic_0001>
module attributes {stable_mosaic.version = 11 : i64} {
  func.func @gat_imputer_kernel(%arg0: memref<10xf32, #tpu.memory_space<smem>>, %arg1: memref<12x16xf32, #tpu.memory_space<vmem>>, %arg2: memref<12x12xf32, #tpu.memory_space<vmem>>, %arg3: memref<16x8xf32, #tpu.memory_space<vmem>>, %arg4: memref<4x8xf32, #tpu.memory_space<vmem>>, %arg5: memref<4x16xf32, #tpu.memory_space<vmem>>, %arg6: memref<8x16xf32, #tpu.memory_space<vmem>>, %arg7: memref<12x16xf32, #tpu.memory_space<vmem>>) attributes {dimension_semantics = [], scalar_prefetch = 0 : i64, scratch_operands = 0 : i64, tpu.core_type = #tpu.core_type<tc>} {
    %c0 = arith.constant 0 : index
    %c0_0 = arith.constant 0 : index
    %0 = vector.load %arg1[%c0, %c0_0] : memref<12x16xf32, #tpu.memory_space<vmem>>, vector<12x16xf32>
    %c0_1 = arith.constant 0 : index
    %c0_2 = arith.constant 0 : index
    %1 = vector.load %arg2[%c0_1, %c0_2] : memref<12x12xf32, #tpu.memory_space<vmem>>, vector<12x12xf32>
    %c0_3 = arith.constant 0 : index
    %c0_4 = arith.constant 0 : index
    %2 = vector.load %arg6[%c0_3, %c0_4] : memref<8x16xf32, #tpu.memory_space<vmem>>, vector<8x16xf32>
    %3 = vector.extract_strided_slice %2 {offsets = [0, 0], sizes = [1, 4], strides = [1, 1]} : vector<8x16xf32> to vector<1x4xf32>
    %4 = vector.extract_strided_slice %2 {offsets = [1, 0], sizes = [1, 4], strides = [1, 1]} : vector<8x16xf32> to vector<1x4xf32>
    %5 = vector.extract_strided_slice %2 {offsets = [2, 0], sizes = [1, 4], strides = [1, 1]} : vector<8x16xf32> to vector<1x4xf32>
    %6 = vector.extract_strided_slice %2 {offsets = [3, 0], sizes = [1, 4], strides = [1, 1]} : vector<8x16xf32> to vector<1x4xf32>
    %7 = vector.extract_strided_slice %2 {offsets = [4, 0], sizes = [1, 4], strides = [1, 1]} : vector<8x16xf32> to vector<1x4xf32>
    %8 = vector.extract_strided_slice %2 {offsets = [5, 0], sizes = [1, 4], strides = [1, 1]} : vector<8x16xf32> to vector<1x4xf32>
    %9 = vector.extract_strided_slice %2 {offsets = [6, 0], sizes = [1, 16], strides = [1, 1]} : vector<8x16xf32> to vector<1x16xf32>
    %c0_5 = arith.constant 0 : index
    %c0_6 = arith.constant 0 : index
    %10 = vector.load %arg3[%c0_5, %c0_6] : memref<16x8xf32, #tpu.memory_space<vmem>>, vector<16x8xf32>
    %cst = arith.constant dense<0.000000e+00> : vector<12x8xf32>
    %11 = tpu.matmul %0, %10, %cst {dimension_numbers = #tpu.dot_dimension_numbers<[1], [0], [0], [1], [0, 0, 1, 1], [], []>} : vector<12x16xf32>, vector<16x8xf32>, vector<12x8xf32> -> vector<12x8xf32>
    %12 = vector.extract_strided_slice %11 {offsets = [0, 0], sizes = [12, 4], strides = [1, 1]} : vector<12x8xf32> to vector<12x4xf32>
    %13 = vector.broadcast %3 : vector<1x4xf32> to vector<12x4xf32>
    %14 = arith.addf %12, %13 : vector<12x4xf32>
    %15 = vector.extract_strided_slice %11 {offsets = [0, 4], sizes = [12, 4], strides = [1, 1]} : vector<12x8xf32> to vector<12x4xf32>
    %16 = vector.broadcast %4 : vector<1x4xf32> to vector<12x4xf32>
    %17 = arith.addf %15, %16 : vector<12x4xf32>
    %18 = tpu.transpose %14, [1, 0] : vector<12x4xf32> -> vector<4x12xf32>
    %cst_7 = arith.constant 0.000000e+00 : f32
    %19 = vector.broadcast %cst_7 : f32 to vector<12x12xf32>
    %cst_8 = arith.constant 0.000000e+00 : f32
    %20 = vector.broadcast %cst_8 : f32 to vector<1x12xf32>
    %cst_9 = arith.constant 0.000000e+00 : f32
    %21 = vector.broadcast %cst_9 : f32 to vector<12x1xf32>
    %c0_10 = arith.constant 0 : index
    %22 = memref.load %arg0[%c0_10] : memref<10xf32, #tpu.memory_space<smem>>
    %23 = vector.extract_strided_slice %18 {offsets = [0, 0], sizes = [1, 12], strides = [1, 1]} : vector<4x12xf32> to vector<1x12xf32>
    %24 = vector.extract_strided_slice %17 {offsets = [0, 0], sizes = [12, 1], strides = [1, 1]} : vector<12x4xf32> to vector<12x1xf32>
    %cst_11 = arith.constant 4.000000e-01 : f32
    %25 = arith.mulf %cst_11, %22 : f32
    %26 = vector.broadcast %24 : vector<12x1xf32> to vector<12x12xf32>
    %27 = vector.broadcast %23 : vector<1x12xf32> to vector<12x12xf32>
    %28 = arith.addf %26, %27 : vector<12x12xf32>
    %29 = math.absf %28 : vector<12x12xf32>
    %30 = vector.broadcast %25 : f32 to vector<12x12xf32>
    %31 = arith.mulf %30, %29 : vector<12x12xf32>
    %32 = arith.addf %19, %31 : vector<12x12xf32>
    %cst_12 = arith.constant 6.000000e-01 : f32
    %33 = arith.mulf %cst_12, %22 : f32
    %34 = vector.broadcast %33 : f32 to vector<1x12xf32>
    %35 = arith.mulf %34, %23 : vector<1x12xf32>
    %36 = arith.addf %20, %35 : vector<1x12xf32>
    %cst_13 = arith.constant 6.000000e-01 : f32
    %37 = arith.mulf %cst_13, %22 : f32
    %38 = vector.broadcast %37 : f32 to vector<12x1xf32>
    %39 = arith.mulf %38, %24 : vector<12x1xf32>
    %40 = arith.addf %21, %39 : vector<12x1xf32>
    %c1 = arith.constant 1 : index
    %41 = memref.load %arg0[%c1] : memref<10xf32, #tpu.memory_space<smem>>
    %42 = vector.extract_strided_slice %18 {offsets = [1, 0], sizes = [1, 12], strides = [1, 1]} : vector<4x12xf32> to vector<1x12xf32>
    %43 = vector.extract_strided_slice %17 {offsets = [0, 1], sizes = [12, 1], strides = [1, 1]} : vector<12x4xf32> to vector<12x1xf32>
    %cst_14 = arith.constant 4.000000e-01 : f32
    %44 = arith.mulf %cst_14, %41 : f32
    %45 = vector.broadcast %43 : vector<12x1xf32> to vector<12x12xf32>
    %46 = vector.broadcast %42 : vector<1x12xf32> to vector<12x12xf32>
    %47 = arith.addf %45, %46 : vector<12x12xf32>
    %48 = math.absf %47 : vector<12x12xf32>
    %49 = vector.broadcast %44 : f32 to vector<12x12xf32>
    %50 = arith.mulf %49, %48 : vector<12x12xf32>
    %51 = arith.addf %32, %50 : vector<12x12xf32>
    %cst_15 = arith.constant 6.000000e-01 : f32
    %52 = arith.mulf %cst_15, %41 : f32
    %53 = vector.broadcast %52 : f32 to vector<1x12xf32>
    %54 = arith.mulf %53, %42 : vector<1x12xf32>
    %55 = arith.addf %36, %54 : vector<1x12xf32>
    %cst_16 = arith.constant 6.000000e-01 : f32
    %56 = arith.mulf %cst_16, %41 : f32
    %57 = vector.broadcast %56 : f32 to vector<12x1xf32>
    %58 = arith.mulf %57, %43 : vector<12x1xf32>
    %59 = arith.addf %40, %58 : vector<12x1xf32>
    %c2 = arith.constant 2 : index
    %60 = memref.load %arg0[%c2] : memref<10xf32, #tpu.memory_space<smem>>
    %61 = vector.extract_strided_slice %18 {offsets = [2, 0], sizes = [1, 12], strides = [1, 1]} : vector<4x12xf32> to vector<1x12xf32>
    %62 = vector.extract_strided_slice %17 {offsets = [0, 2], sizes = [12, 1], strides = [1, 1]} : vector<12x4xf32> to vector<12x1xf32>
    %cst_17 = arith.constant 4.000000e-01 : f32
    %63 = arith.mulf %cst_17, %60 : f32
    %64 = vector.broadcast %62 : vector<12x1xf32> to vector<12x12xf32>
    %65 = vector.broadcast %61 : vector<1x12xf32> to vector<12x12xf32>
    %66 = arith.addf %64, %65 : vector<12x12xf32>
    %67 = math.absf %66 : vector<12x12xf32>
    %68 = vector.broadcast %63 : f32 to vector<12x12xf32>
    %69 = arith.mulf %68, %67 : vector<12x12xf32>
    %70 = arith.addf %51, %69 : vector<12x12xf32>
    %cst_18 = arith.constant 6.000000e-01 : f32
    %71 = arith.mulf %cst_18, %60 : f32
    %72 = vector.broadcast %71 : f32 to vector<1x12xf32>
    %73 = arith.mulf %72, %61 : vector<1x12xf32>
    %74 = arith.addf %55, %73 : vector<1x12xf32>
    %cst_19 = arith.constant 6.000000e-01 : f32
    %75 = arith.mulf %cst_19, %60 : f32
    %76 = vector.broadcast %75 : f32 to vector<12x1xf32>
    %77 = arith.mulf %76, %62 : vector<12x1xf32>
    %78 = arith.addf %59, %77 : vector<12x1xf32>
    %c3 = arith.constant 3 : index
    %79 = memref.load %arg0[%c3] : memref<10xf32, #tpu.memory_space<smem>>
    %80 = vector.extract_strided_slice %18 {offsets = [3, 0], sizes = [1, 12], strides = [1, 1]} : vector<4x12xf32> to vector<1x12xf32>
    %81 = vector.extract_strided_slice %17 {offsets = [0, 3], sizes = [12, 1], strides = [1, 1]} : vector<12x4xf32> to vector<12x1xf32>
    %cst_20 = arith.constant 4.000000e-01 : f32
    %82 = arith.mulf %cst_20, %79 : f32
    %83 = vector.broadcast %81 : vector<12x1xf32> to vector<12x12xf32>
    %84 = vector.broadcast %80 : vector<1x12xf32> to vector<12x12xf32>
    %85 = arith.addf %83, %84 : vector<12x12xf32>
    %86 = math.absf %85 : vector<12x12xf32>
    %87 = vector.broadcast %82 : f32 to vector<12x12xf32>
    %88 = arith.mulf %87, %86 : vector<12x12xf32>
    %89 = arith.addf %70, %88 : vector<12x12xf32>
    %cst_21 = arith.constant 6.000000e-01 : f32
    %90 = arith.mulf %cst_21, %79 : f32
    %91 = vector.broadcast %90 : f32 to vector<1x12xf32>
    %92 = arith.mulf %91, %80 : vector<1x12xf32>
    %93 = arith.addf %74, %92 : vector<1x12xf32>
    %cst_22 = arith.constant 6.000000e-01 : f32
    %94 = arith.mulf %cst_22, %79 : f32
    %95 = vector.broadcast %94 : f32 to vector<12x1xf32>
    %96 = arith.mulf %95, %81 : vector<12x1xf32>
    %97 = arith.addf %78, %96 : vector<12x1xf32>
    %98 = vector.broadcast %97 : vector<12x1xf32> to vector<12x12xf32>
    %99 = vector.broadcast %93 : vector<1x12xf32> to vector<12x12xf32>
    %100 = arith.addf %98, %99 : vector<12x12xf32>
    %101 = arith.addf %100, %89 : vector<12x12xf32>
    %102 = arith.addf %101, %1 : vector<12x12xf32>
    %cst_23 = arith.constant dense<0xFF800000> : vector<12xf32>
    %103 = vector.multi_reduction <maximumf>, %102, %cst_23 [1] : vector<12x12xf32> to vector<12xf32>
    %104 = vector.shape_cast %103 : vector<12xf32> to vector<12x1xf32>
    %105 = vector.broadcast %104 : vector<12x1xf32> to vector<12x12xf32>
    %106 = arith.subf %102, %105 : vector<12x12xf32>
    %107 = math.exp %106 : vector<12x12xf32>
    %cst_24 = arith.constant dense<0.000000e+00> : vector<12xf32>
    %108 = vector.multi_reduction <add>, %107, %cst_24 [1] : vector<12x12xf32> to vector<12xf32>
    %109 = vector.shape_cast %108 : vector<12xf32> to vector<12x1xf32>
    %110 = tpu.reciprocal %109 {approx = true} : vector<12x1xf32> -> vector<12x1xf32>
    %111 = vector.broadcast %110 : vector<12x1xf32> to vector<12x12xf32>
    %112 = arith.mulf %107, %111 : vector<12x12xf32>
    %cst_25 = arith.constant dense<0.000000e+00> : vector<12x4xf32>
    %113 = tpu.matmul %112, %14, %cst_25 {dimension_numbers = #tpu.dot_dimension_numbers<[1], [0], [0], [1], [0, 0, 1, 1], [], []>} : vector<12x12xf32>, vector<12x4xf32>, vector<12x4xf32> -> vector<12x4xf32>
    %114 = vector.broadcast %5 : vector<1x4xf32> to vector<12x4xf32>
    %115 = arith.addf %113, %114 : vector<12x4xf32>
    %cst_26 = arith.constant 0.000000e+00 : f32
    %116 = vector.broadcast %cst_26 : f32 to vector<12x4xf32>
    %117 = arith.maximumf %115, %116 : vector<12x4xf32>
    %c0_27 = arith.constant 0 : index
    %c0_28 = arith.constant 0 : index
    %118 = vector.load %arg4[%c0_27, %c0_28] : memref<4x8xf32, #tpu.memory_space<vmem>>, vector<4x8xf32>
    %cst_29 = arith.constant dense<0.000000e+00> : vector<12x8xf32>
    %119 = tpu.matmul %117, %118, %cst_29 {dimension_numbers = #tpu.dot_dimension_numbers<[1], [0], [0], [1], [0, 0, 1, 1], [], []>} : vector<12x4xf32>, vector<4x8xf32>, vector<12x8xf32> -> vector<12x8xf32>
    %120 = vector.extract_strided_slice %119 {offsets = [0, 0], sizes = [12, 4], strides = [1, 1]} : vector<12x8xf32> to vector<12x4xf32>
    %121 = vector.broadcast %6 : vector<1x4xf32> to vector<12x4xf32>
    %122 = arith.addf %120, %121 : vector<12x4xf32>
    %123 = vector.extract_strided_slice %119 {offsets = [0, 4], sizes = [12, 4], strides = [1, 1]} : vector<12x8xf32> to vector<12x4xf32>
    %124 = vector.broadcast %7 : vector<1x4xf32> to vector<12x4xf32>
    %125 = arith.addf %123, %124 : vector<12x4xf32>
    %126 = tpu.transpose %122, [1, 0] : vector<12x4xf32> -> vector<4x12xf32>
    %cst_30 = arith.constant 0.000000e+00 : f32
    %127 = vector.broadcast %cst_30 : f32 to vector<12x12xf32>
    %cst_31 = arith.constant 0.000000e+00 : f32
    %128 = vector.broadcast %cst_31 : f32 to vector<1x12xf32>
    %cst_32 = arith.constant 0.000000e+00 : f32
    %129 = vector.broadcast %cst_32 : f32 to vector<12x1xf32>
    %c4 = arith.constant 4 : index
    %130 = memref.load %arg0[%c4] : memref<10xf32, #tpu.memory_space<smem>>
    %131 = vector.extract_strided_slice %126 {offsets = [0, 0], sizes = [1, 12], strides = [1, 1]} : vector<4x12xf32> to vector<1x12xf32>
    %132 = vector.extract_strided_slice %125 {offsets = [0, 0], sizes = [12, 1], strides = [1, 1]} : vector<12x4xf32> to vector<12x1xf32>
    %cst_33 = arith.constant 4.000000e-01 : f32
    %133 = arith.mulf %cst_33, %130 : f32
    %134 = vector.broadcast %132 : vector<12x1xf32> to vector<12x12xf32>
    %135 = vector.broadcast %131 : vector<1x12xf32> to vector<12x12xf32>
    %136 = arith.addf %134, %135 : vector<12x12xf32>
    %137 = math.absf %136 : vector<12x12xf32>
    %138 = vector.broadcast %133 : f32 to vector<12x12xf32>
    %139 = arith.mulf %138, %137 : vector<12x12xf32>
    %140 = arith.addf %127, %139 : vector<12x12xf32>
    %cst_34 = arith.constant 6.000000e-01 : f32
    %141 = arith.mulf %cst_34, %130 : f32
    %142 = vector.broadcast %141 : f32 to vector<1x12xf32>
    %143 = arith.mulf %142, %131 : vector<1x12xf32>
    %144 = arith.addf %128, %143 : vector<1x12xf32>
    %cst_35 = arith.constant 6.000000e-01 : f32
    %145 = arith.mulf %cst_35, %130 : f32
    %146 = vector.broadcast %145 : f32 to vector<12x1xf32>
    %147 = arith.mulf %146, %132 : vector<12x1xf32>
    %148 = arith.addf %129, %147 : vector<12x1xf32>
    %c5 = arith.constant 5 : index
    %149 = memref.load %arg0[%c5] : memref<10xf32, #tpu.memory_space<smem>>
    %150 = vector.extract_strided_slice %126 {offsets = [1, 0], sizes = [1, 12], strides = [1, 1]} : vector<4x12xf32> to vector<1x12xf32>
    %151 = vector.extract_strided_slice %125 {offsets = [0, 1], sizes = [12, 1], strides = [1, 1]} : vector<12x4xf32> to vector<12x1xf32>
    %cst_36 = arith.constant 4.000000e-01 : f32
    %152 = arith.mulf %cst_36, %149 : f32
    %153 = vector.broadcast %151 : vector<12x1xf32> to vector<12x12xf32>
    %154 = vector.broadcast %150 : vector<1x12xf32> to vector<12x12xf32>
    %155 = arith.addf %153, %154 : vector<12x12xf32>
    %156 = math.absf %155 : vector<12x12xf32>
    %157 = vector.broadcast %152 : f32 to vector<12x12xf32>
    %158 = arith.mulf %157, %156 : vector<12x12xf32>
    %159 = arith.addf %140, %158 : vector<12x12xf32>
    %cst_37 = arith.constant 6.000000e-01 : f32
    %160 = arith.mulf %cst_37, %149 : f32
    %161 = vector.broadcast %160 : f32 to vector<1x12xf32>
    %162 = arith.mulf %161, %150 : vector<1x12xf32>
    %163 = arith.addf %144, %162 : vector<1x12xf32>
    %cst_38 = arith.constant 6.000000e-01 : f32
    %164 = arith.mulf %cst_38, %149 : f32
    %165 = vector.broadcast %164 : f32 to vector<12x1xf32>
    %166 = arith.mulf %165, %151 : vector<12x1xf32>
    %167 = arith.addf %148, %166 : vector<12x1xf32>
    %c6 = arith.constant 6 : index
    %168 = memref.load %arg0[%c6] : memref<10xf32, #tpu.memory_space<smem>>
    %169 = vector.extract_strided_slice %126 {offsets = [2, 0], sizes = [1, 12], strides = [1, 1]} : vector<4x12xf32> to vector<1x12xf32>
    %170 = vector.extract_strided_slice %125 {offsets = [0, 2], sizes = [12, 1], strides = [1, 1]} : vector<12x4xf32> to vector<12x1xf32>
    %cst_39 = arith.constant 4.000000e-01 : f32
    %171 = arith.mulf %cst_39, %168 : f32
    %172 = vector.broadcast %170 : vector<12x1xf32> to vector<12x12xf32>
    %173 = vector.broadcast %169 : vector<1x12xf32> to vector<12x12xf32>
    %174 = arith.addf %172, %173 : vector<12x12xf32>
    %175 = math.absf %174 : vector<12x12xf32>
    %176 = vector.broadcast %171 : f32 to vector<12x12xf32>
    %177 = arith.mulf %176, %175 : vector<12x12xf32>
    %178 = arith.addf %159, %177 : vector<12x12xf32>
    %cst_40 = arith.constant 6.000000e-01 : f32
    %179 = arith.mulf %cst_40, %168 : f32
    %180 = vector.broadcast %179 : f32 to vector<1x12xf32>
    %181 = arith.mulf %180, %169 : vector<1x12xf32>
    %182 = arith.addf %163, %181 : vector<1x12xf32>
    %cst_41 = arith.constant 6.000000e-01 : f32
    %183 = arith.mulf %cst_41, %168 : f32
    %184 = vector.broadcast %183 : f32 to vector<12x1xf32>
    %185 = arith.mulf %184, %170 : vector<12x1xf32>
    %186 = arith.addf %167, %185 : vector<12x1xf32>
    %c7 = arith.constant 7 : index
    %187 = memref.load %arg0[%c7] : memref<10xf32, #tpu.memory_space<smem>>
    %188 = vector.extract_strided_slice %126 {offsets = [3, 0], sizes = [1, 12], strides = [1, 1]} : vector<4x12xf32> to vector<1x12xf32>
    %189 = vector.extract_strided_slice %125 {offsets = [0, 3], sizes = [12, 1], strides = [1, 1]} : vector<12x4xf32> to vector<12x1xf32>
    %cst_42 = arith.constant 4.000000e-01 : f32
    %190 = arith.mulf %cst_42, %187 : f32
    %191 = vector.broadcast %189 : vector<12x1xf32> to vector<12x12xf32>
    %192 = vector.broadcast %188 : vector<1x12xf32> to vector<12x12xf32>
    %193 = arith.addf %191, %192 : vector<12x12xf32>
    %194 = math.absf %193 : vector<12x12xf32>
    %195 = vector.broadcast %190 : f32 to vector<12x12xf32>
    %196 = arith.mulf %195, %194 : vector<12x12xf32>
    %197 = arith.addf %178, %196 : vector<12x12xf32>
    %cst_43 = arith.constant 6.000000e-01 : f32
    %198 = arith.mulf %cst_43, %187 : f32
    %199 = vector.broadcast %198 : f32 to vector<1x12xf32>
    %200 = arith.mulf %199, %188 : vector<1x12xf32>
    %201 = arith.addf %182, %200 : vector<1x12xf32>
    %cst_44 = arith.constant 6.000000e-01 : f32
    %202 = arith.mulf %cst_44, %187 : f32
    %203 = vector.broadcast %202 : f32 to vector<12x1xf32>
    %204 = arith.mulf %203, %189 : vector<12x1xf32>
    %205 = arith.addf %186, %204 : vector<12x1xf32>
    %206 = vector.broadcast %205 : vector<12x1xf32> to vector<12x12xf32>
    %207 = vector.broadcast %201 : vector<1x12xf32> to vector<12x12xf32>
    %208 = arith.addf %206, %207 : vector<12x12xf32>
    %209 = arith.addf %208, %197 : vector<12x12xf32>
    %210 = arith.addf %209, %1 : vector<12x12xf32>
    %cst_45 = arith.constant dense<0xFF800000> : vector<12xf32>
    %211 = vector.multi_reduction <maximumf>, %210, %cst_45 [1] : vector<12x12xf32> to vector<12xf32>
    %212 = vector.shape_cast %211 : vector<12xf32> to vector<12x1xf32>
    %213 = vector.broadcast %212 : vector<12x1xf32> to vector<12x12xf32>
    %214 = arith.subf %210, %213 : vector<12x12xf32>
    %215 = math.exp %214 : vector<12x12xf32>
    %cst_46 = arith.constant dense<0.000000e+00> : vector<12xf32>
    %216 = vector.multi_reduction <add>, %215, %cst_46 [1] : vector<12x12xf32> to vector<12xf32>
    %217 = vector.shape_cast %216 : vector<12xf32> to vector<12x1xf32>
    %218 = tpu.reciprocal %217 {approx = true} : vector<12x1xf32> -> vector<12x1xf32>
    %219 = vector.broadcast %218 : vector<12x1xf32> to vector<12x12xf32>
    %220 = arith.mulf %215, %219 : vector<12x12xf32>
    %cst_47 = arith.constant dense<0.000000e+00> : vector<12x4xf32>
    %221 = tpu.matmul %220, %122, %cst_47 {dimension_numbers = #tpu.dot_dimension_numbers<[1], [0], [0], [1], [0, 0, 1, 1], [], []>} : vector<12x12xf32>, vector<12x4xf32>, vector<12x4xf32> -> vector<12x4xf32>
    %222 = vector.broadcast %8 : vector<1x4xf32> to vector<12x4xf32>
    %223 = arith.addf %221, %222 : vector<12x4xf32>
    %cst_48 = arith.constant 0.000000e+00 : f32
    %224 = vector.broadcast %cst_48 : f32 to vector<12x4xf32>
    %225 = arith.maximumf %223, %224 : vector<12x4xf32>
    %c0_49 = arith.constant 0 : index
    %c0_50 = arith.constant 0 : index
    %226 = vector.load %arg5[%c0_49, %c0_50] : memref<4x16xf32, #tpu.memory_space<vmem>>, vector<4x16xf32>
    %cst_51 = arith.constant dense<0.000000e+00> : vector<12x16xf32>
    %227 = tpu.matmul %225, %226, %cst_51 {dimension_numbers = #tpu.dot_dimension_numbers<[1], [0], [0], [1], [0, 0, 1, 1], [], []>} : vector<12x4xf32>, vector<4x16xf32>, vector<12x16xf32> -> vector<12x16xf32>
    %228 = vector.broadcast %9 : vector<1x16xf32> to vector<12x16xf32>
    %229 = arith.addf %227, %228 : vector<12x16xf32>
    %230 = arith.negf %229 : vector<12x16xf32>
    %231 = math.exp %230 : vector<12x16xf32>
    %cst_52 = arith.constant 1.000000e+00 : f32
    %232 = vector.broadcast %cst_52 : f32 to vector<12x16xf32>
    %233 = arith.addf %232, %231 : vector<12x16xf32>
    %234 = arith.divf %232, %233 : vector<12x16xf32>
    %c8 = arith.constant 8 : index
    %235 = memref.load %arg0[%c8] : memref<10xf32, #tpu.memory_space<smem>>
    %c9 = arith.constant 9 : index
    %236 = memref.load %arg0[%c9] : memref<10xf32, #tpu.memory_space<smem>>
    %237 = arith.subf %236, %235 : f32
    %238 = vector.broadcast %237 : f32 to vector<12x16xf32>
    %239 = arith.mulf %234, %238 : vector<12x16xf32>
    %240 = vector.broadcast %235 : f32 to vector<12x16xf32>
    %241 = arith.addf %239, %240 : vector<12x16xf32>
    %c0_53 = arith.constant 0 : index
    %c0_54 = arith.constant 0 : index
    %242 = vector.load %arg7[%c0_53, %c0_54] : memref<12x16xf32, #tpu.memory_space<vmem>>, vector<12x16xf32>
    tpu.vector_store %arg7[%c0_53, %c0_54], %241 {strides = array<i32>} : memref<12x16xf32, #tpu.memory_space<vmem>>, vector<12x16xf32>,
    return
  }
}

</mosaic_0001>

<bundles_post_ra>
// kernel: gat_imputer_forward.1
= control target key start
LH: loop header
LB: loop body
LE: loop exit
PB: predicated region body
PF: predicated region fallthrough
CT: control target
= control target key end

     0   :  { %12 = vsyncpa [#allocation4], 0  ;;  %s1479_s0 = inlined_call_operand.vmem [shape: f32[10], index: 0, kind: input, shape index: {}]   ;;  %s1480_s1 = inlined_call_operand.vmem [shape: f32[12,16], index: 1, kind: input, shape index: {}]   ;;  %s1481_s2 = inlined_call_operand.vmem [shape: f32[12,12], index: 2, kind: input, shape index: {}]   ;;  %s1482_s3 = inlined_call_operand.vmem [shape: f32[16,8], index: 3, kind: input, shape index: {}]   ;;  %s1483_s4 = inlined_call_operand.vmem [shape: f32[4,8], index: 4, kind: input, shape index: {}]   ;;  %s1484_s5 = inlined_call_operand.vmem [shape: f32[4,16], index: 5, kind: input, shape index: {}]   ;;  %s1485_s6 = inlined_call_operand.vmem [shape: f32[8,16], index: 6, kind: input, shape index: {}]   ;;  %s1486_s7 = inlined_call_operand.hbm [shape: f32[12,16], index: 7, kind: output, shape index: {}]  }
   0x1   :  { %13 = vsyncpa [#allocation3], 0  ;;  %s20_s26 = sshll.u32 %s1479_s0, 4  ;;  %s21_s26 = int_to_ptr.vmem [resolvable:$true] %s20_s26 }
   0x2   :  { %s1170_s27 = scalar_lea.vmem %s21_s26, 16  ;;  %p1175_p1 = scmp.lt.s32.totalorder %s21_s26, %s21_s26 }
   0x3   :  { %p1171_p0 = scmp.ne.s32.totalorder %s21_s26, %s1170_s27  ;;  %p1176_p2 = scmp.lt.s32.totalorder %s1170_s27, %s1170_s27 }
   0x5   :  { %p1177_p3 = por %p1176_p2, %p1175_p1 }
   0x7   :  { %p1178_p4 = pnand %p1177_p3, %p1171_p0 }
   0x9   :  { %1181 = shalt.err (!%p1178_p4)
}
   0xa   :  { %s1208_s28 = smov [#allocation2]  }
   0xb   :  { %23 = dma.vmem_to_smem %s21_s26, 16, %s1208_s28, [#allocation4]  }
   0xc   :  { %1204 = dma.done.wait [#allocation4], 16  }
   0xd   :  { %1205 = vsyncadd [#allocation4], 4294967280 }
   0xe   :  { %39 = sfence }
   0xf   :  { %v45_v0 = vld [vmem:[%s1482_s3] sm:$0xff]  ;;  %v46_v1 = vld [vmem:[%s1482_s3 + $0x8] sm:$0xff]  ;;  %vm47_vm0 = vcmask 130048   ;;  %v129_v3 = vlaneseq  ;;  %s1209_s14 = smov 4   ;;  %v1210_v10 = vmov 4   ;;  %v1211_v11 = vmov 5  }
  0x10   :  { %v40_v2 = vld [vmem:[%s1480_s1] sm:$0xff]  ;;  %v1100_v4 = vpack.c.bf16 %v46_v1, %v45_v0  ;;  %v41_v7 = vld [vmem:[%s1480_s1 + $0x8] sm:$0xf]  ;;  %1130 = vset.pattern.permute.xlu1 %v1210_v10  ;;  %1131 = vset.pattern.permute.xlu0 %v1211_v11  ;;  %s1295_s1 = sld [smem:[#allocation2 + $0x2]]  ;;  %s1301_s16 = sld [smem:[#allocation2 + $0x3]]  ;;  %vm390_vm1 = vcmask 1043456  }
  0x11   :  { %1073 = vmatprep.mubr.msk.f32.mxu0 %vm47_vm0, %v40_v2  ;;  %v1274_v5 = vshrl.u32 %v129_v3, 7  ;;  %v1279_v6 = vld [vmem:[%s1485_s6] sm:$0xff]  ;;  %s1293_s6 = sld [smem:[#allocation2 + $0x1]]  ;;  %vm1212_vm2 = vmmov 1   ;;  %s1213_s19 = smov 127   ;;  %v1216_v32 = vmov 6  }
  0x12   :  { %1101 = vmatprep.subr.bf16.mxu0 %v1100_v4  ;;  %vm1310_vm3 = vmpackc.low %vm390_vm1, %vm1212_vm2  ;;  %s1214_s20 = smov 126   ;;  %s1215_s21 = smov 125   ;;  %v1217_v33 = vmov 7   ;;  %vm356_vm4 = vcmask 97280   ;;  %vm360_vm5 = vcmask 93184   ;;  %vm472_vm6 = vcmask 31744  }
  0x13   :  { %1103 = vmatpush3.bf16.msra.mxu0 %v1100_v4  ;;  %v1285_v8 = vsub.s32 1, %v1274_v5  ;;  %v1298_v12 = vsub.s32 0, %v1274_v5  ;;  %s1341_s22 = sld [smem:[#allocation2]]  ;;  %v1347_v58 = vsub.s32 2, %v1274_v5  ;;  %v1353_v62 = vsub.s32 3, %v1274_v5  ;;  %s1394_s0 = sld [smem:[#allocation2 + $0x5]] }
  0x14   :  { %s1396_s10 = sld [smem:[#allocation2 + $0x6]]  ;;  %s1432_s3 = sld [smem:[#allocation2 + $0x4]]  ;;  %vm1007_vm7 = vcmask 125952  }
  0x15   :  { %v138_v9 = vrot.slane %v1279_v6, %v1285_v8  ;;  %v132_v13 = vrot.slane %v1279_v6, %v1298_v12 }
  0x16   :  { %1074 = vmatmul.mubr.msk.f32.vlgmr.msra.gmra.mrb[0].mxu0 %vm47_vm0, %v41_v7  ;;  %s275_s17 = smul.f32 0.6, %s1295_s1 }
  0x17   :  { %140 = vrot.lane.b32.xlu0 %v138_v9, %s1209_s14  ;;  %s233_s15 = smul.f32 0.6, %s1293_s6 }
  0x18   :  { %v1315_v26 = vstv %s275_s17  ;;  %s317_s18 = smul.f32 0.6, %s1301_s16 }
  0x19   :  { %v1305_v16 = vstv %s233_s15  ;;  %s202_s23 = smul.f32 0.6, %s1341_s22 }
  0x1a   :  { %v1326_v29 = vstv %s317_s18  ;;  %s178_s24 = smul.f32 0.4, %s1341_s22 }
  0x1b   :  { %v203_v34 = vstv %s202_s23  ;;  %s211_s25 = smul.f32 0.4, %s1293_s6 }
  0x1c   :  { %s253_s26 = smul.f32 0.4, %s1295_s1 }
  0x1d   :  { %s295_s27 = smul.f32 0.4, %s1301_s16 }
  0x1e   :  { %s661_s12 = smul.f32 0.6, %s1394_s0 }
  0x1f   :  { %s703_s13 = smul.f32 0.6, %s1396_s10 }
  0x20   :  { %s606_s6 = smul.f32 0.4, %s1432_s3 }
  0x21   :  { %s639_s1 = smul.f32 0.4, %s1394_s0 }
  0x22   :  { %s681_s15 = smul.f32 0.4, %s1396_s10 }
  0x89   :  { %v141_v14 = vpop.permute.xlu0 %140 }
  0xe9   :  { %v1075_v15 = vpop.f32.mrb[0].mxu0 }
  0xea   :  { %v134_v17 = vadd.f32 %v1075_v15, %v132_v13  ;;  %v144_v18 = vadd.f32 %v1075_v15, %v141_v14  ;;  %v120_v19 = vpop.f32.mrb[1].mxu0  ;;  %v228_v15 = vstv %s211_s25 }
  0xeb   :  { %v133_v20 = vadd.f32 %v132_v13, %v120_v19  ;;  %v143_v21 = vadd.f32 %v141_v14, %v120_v19  ;;  %v197_v14 = vstv %s178_s24 }
  0xec   :  { %v241_v22 = vmul.f32 %v1305_v16, %v144_v18  ;;  %v283_v28 = vmul.f32 %v1315_v26, %v144_v18  ;;  %v325_v31 = vmul.f32 %v1326_v29, %v144_v18  ;;  %v207_v41 = vmul.f32 %v203_v34, %v144_v18 }
  0xed   :  { %v240_v24 = vmul.f32 %v1305_v16, %v143_v21  ;;  %v1104_v25 = vpack.c.bf16 %v134_v17, %v133_v20  ;;  %v282_v27 = vmul.f32 %v1315_v26, %v143_v21  ;;  %v324_v30 = vmul.f32 %v1326_v29, %v143_v21 }
  0xee   :  { %246 = vrot.lane.b32.xlu1 %v241_v22, %s1213_s19  ;;  %v206_v37 = vmul.f32 %v203_v34, %v143_v21 }
  0xef   :  { %244 = vrot.lane.b32.xlu0 %v240_v24, %s1213_s19  ;;  %1106 = vmatprep.subr.msk.bf16.mxu1 %vm1310_vm3, %v1104_v25 }
  0xf0   :  { %1109 = vmatpush3.bf16.msk.msra.mxu1 %vm1310_vm3, %v1104_v25 }
  0xf2   :  { %286 = vrot.lane.b32.xlu1 %v282_v27, %s1214_s20 }
  0xf3   :  { %288 = vrot.lane.b32.xlu0 %v283_v28, %s1214_s20 }
  0xf6   :  { %328 = vrot.lane.b32.xlu1 %v324_v30, %s1215_s21 }
  0xf7   :  { %330 = vrot.lane.b32.xlu0 %v325_v31, %s1215_s21 }
  0xfa   :  { %181 = vperm.xlu1 %1130, %v143_v21  }
  0xfb   :  { %213 = vperm.xlu0 %1131, %v143_v21  }
  0xfe   :  { %186 = vperm.xlu1 %1130, %v144_v18  }
  0xff   :  { %1133 = vset.pattern.permute.xlu0 %v1216_v32 }
 0x100   :  { %255 = vperm.xlu0 %1133, %v143_v21  }
 0x102   :  { %1132 = vset.pattern.permute.xlu1 %v1211_v11 }
 0x103   :  { %217 = vperm.xlu1 %1132, %v144_v18  }
 0x104   :  { %1136 = vset.pattern.permute.xlu0 %v1217_v33 }
 0x105   :  { %301 = vperm.xlu0 %1136, %v144_v18  }
 0x107   :  { %1134 = vset.pattern.permute.xlu1 %v1216_v32 }
 0x108   :  { %259 = vperm.xlu1 %1134, %v144_v18  }
 0x10c   :  { %1135 = vset.pattern.permute.xlu1 %v1217_v33 }
 0x10d   :  { %297 = vperm.xlu1 %1135, %v143_v21  }
 0x111   :  { %1137 = vset.pattern.permute.xlu1 %v1210_v10 }
 0x123   :  { %145 = vxpose.xlu0.b32.start [1/2] (short) (narrow) %v133_v20, 8 }
 0x127   :  { %146 = vxpose.xlu0.b32.end [2/2] (short) (narrow) %v134_v17, 8 }
 0x150   :  { %1142 = vset.pattern.permute.xlu0 %v1216_v32 }
 0x160   :  { %v247_v35 = vpop.permute.xlu1 %246 }
 0x161   :  { %v245_v36 = vpop.permute.xlu0 %244  ;;  %v251_v44 = vadd.f32 %v247_v35, %v207_v41  ;;  %v270_v35 = vstv %s253_s26 }
 0x162   :  { %v250_v38 = vadd.f32 %v245_v36, %v206_v37 }
 0x164   :  { %v287_v39 = vpop.permute.xlu1 %286 }
 0x165   :  { %v289_v40 = vpop.permute.xlu0 %288  ;;  %v292_v42 = vadd.f32 %v287_v39, %v250_v38 }
 0x166   :  { %v293_v47 = vadd.f32 %v289_v40, %v251_v44 }
 0x168   :  { %v329_v43 = vpop.permute.xlu1 %328 }
 0x169   :  { %v334_v45 = vadd.f32 %v329_v43, %v292_v42  ;;  %v331_v46 = vpop.permute.xlu0 %330  ;;  %v312_v43 = vstv %s295_s27 }
 0x16a   :  { %v335_v48 = vadd.f32 %v331_v46, %v293_v47 }
 0x16b   :  { %338 = vperm.xlu1 %1137, %v334_v45  }
 0x16f   :  { %343 = vperm.xlu1 %1137, %v335_v48  }
 0x179   :  { %v182_v51 = vpop.permute.xlu1 %181 }
 0x17a   :  { %v214_v49 = vpop.permute.xlu0 %213 }
 0x17d   :  { %v187_v53 = vpop.permute.xlu1 %186 }
 0x17f   :  { %v256_v50 = vpop.permute.xlu0 %255 }
 0x182   :  { %v218_v55 = vpop.permute.xlu1 %217 }
 0x184   :  { %v302_v52 = vpop.permute.xlu0 %301 }
 0x187   :  { %v260_v63 = vpop.permute.xlu1 %259 }
 0x18c   :  { %v298_v21 = vpop.permute.xlu1 %297 }
 0x1a3   :  { %v161_v54 = vpop.trf.xlu0 }
 0x1a4   :  { %v192_v56 = vrot.slane %v161_v54, %v1298_v12  ;;  %v223_v57 = vrot.slane %v161_v54, %v1285_v8  ;;  %v235_v59 = vmul.f32 %v1305_v16, %v161_v54  ;;  %v204_v0 = vmul.f32 %v203_v34, %v161_v54 }
 0x1a5   :  { %v265_v2 = vrot.slane %v161_v54, %v1347_v58  ;;  %v277_v3 = vmul.f32 %v1315_v26, %v161_v54  ;;  %v307_v16 = vrot.slane %v161_v54, %v1353_v62  ;;  %v319_v20 = vmul.f32 %v1326_v29, %v161_v54 }
 0x1a6   :  { %v193_v60 = vadd.f32 %v192_v56, %v182_v51  ;;  %v224_v61 = vadd.f32 %v223_v57, %v214_v49  ;;  %v237_v1 = vrot.slane %v235_v59, 1  ;;  %v194_v9 = vadd.f32 %v192_v56, %v187_v53 }
 0x1a7   :  { %v225_v13 = vadd.f32 %v223_v57, %v218_v55  ;;  %v266_v18 = vadd.f32 %v265_v2, %v256_v50  ;;  %v279_v19 = vrot.slane %v277_v3, 2  ;;  %v308_v27 = vadd.f32 %v307_v16, %v298_v21  ;;  %v1365_v55 = vld [vmem:[%s1481_s2] sm:$0xff] }
 0x1a8   :  { %v195_v4 = vand.u32 2147483647, %v193_v60  ;;  %v226_v7 = vand.u32 2147483647, %v224_v61  ;;  %v239_v17 = vadd.f32 %v237_v1, %v204_v0  ;;  %v196_v25 = vand.u32 2147483647, %v194_v9 }
 0x1a9   :  { %v227_v26 = vand.u32 2147483647, %v225_v13  ;;  %v268_v28 = vand.u32 2147483647, %v266_v18  ;;  %v321_v31 = vrot.slane %v319_v20, 3  ;;  %v267_v34 = vadd.f32 %v265_v2, %v260_v63 }
 0x1aa   :  { %v198_v22 = vmul.f32 %v197_v14, %v195_v4  ;;  %v229_v24 = vmul.f32 %v228_v15, %v226_v7  ;;  %v281_v30 = vadd.f32 %v279_v19, %v239_v17  ;;  %v199_v37 = vmul.f32 %v197_v14, %v196_v25  ;;  %v1371_v63 = vld [vmem:[%s1481_s2 + $0x8] sm:$0xf] }
 0x1ab   :  { %v230_v38 = vmul.f32 %v228_v15, %v227_v26  ;;  %v310_v39 = vand.u32 2147483647, %v308_v27  ;;  %v271_v40 = vmul.f32 %v270_v35, %v268_v28  ;;  %v269_v29 = vand.u32 2147483647, %v267_v34  ;;  %v471_v27 = vld [vmem:[%s1483_s4] sm:$0xf] }
 0x1ac   :  { %v231_v36 = vadd.f32 %v229_v24, %v198_v22  ;;  %v323_v41 = vadd.f32 %v321_v31, %v281_v30  ;;  %v309_v42 = vadd.f32 %v307_v16, %v302_v52  ;;  %1083 = vmatprep.subr.msk.mxu0 %vm390_vm1, %v471_v27  ;;  %v565_v28 = vsub.s32 4, %v1274_v5  ;;  %s1392_s4 = sld [smem:[#allocation2 + $0x7]] }
 0x1ad   :  { %v232_v45 = vadd.f32 %v230_v38, %v199_v37  ;;  %v313_v46 = vmul.f32 %v312_v43, %v310_v39  ;;  %v272_v48 = vmul.f32 %v270_v35, %v269_v29  ;;  %1084 = vmatpush3.msk.msra.mxu0 %vm390_vm1, %v471_v27  ;;  %v383_v31 = vrot.slane %v1279_v6, %v1347_v58 }
 0x1ae   :  { %v273_v44 = vadd.f32 %v271_v40, %v231_v36  ;;  %v349_v47 = vrot.slane %v323_v41, %v1298_v12  ;;  %v311_v49 = vand.u32 2147483647, %v309_v42  ;;  %v566_v30 = vrot.slane %v1279_v6, %v565_v28 }
 0x1af   :  { %v274_v54 = vadd.f32 %v272_v48, %v232_v45  ;;  %v560_v40 = vrot.slane %v1279_v6, %v1353_v62 }
 0x1b0   :  { %v315_v51 = vadd.f32 %v313_v46, %v273_v44  ;;  %v314_v57 = vmul.f32 %v312_v43, %v311_v49  ;;  %v1404_v43 = vstv %s661_s12 }
 0x1b2   :  { %v316_v59 = vadd.f32 %v314_v57, %v274_v54  ;;  %s745_s11 = smul.f32 0.6, %s1392_s4 }
 0x1b3   :  { %s723_s16 = smul.f32 0.4, %s1392_s4 }
 0x1b4   :  { %v1402_v42 = vstv %s745_s11 }
 0x1ea   :  { %v339_v50 = vpop.permute.xlu1 %338 }
 0x1eb   :  { %v350_v53 = vadd.f32 %v349_v47, %v339_v50 }
 0x1ed   :  { %v352_v56 = vadd.f32 %v350_v53, %v315_v51  ;;  %v1409_v51 = vstv %s703_s13 }
 0x1ee   :  { %v344_v52 = vpop.permute.xlu1 %343 }
 0x1ef   :  { %v351_v60 = vadd.f32 %v349_v47, %v344_v52  ;;  %v354_v61 = vadd.f32 %v352_v56, %v1365_v55 }
 0x1f1   :  { %v353_v0 = vadd.f32 %v351_v60, %v316_v59  ;;  %v357_v1 = vsel %vm356_vm4, %v354_v61, -inf }
 0x1f2   :  { %358 = vmax.xlane.f32.xlu1 %v357_v1 }
 0x1f3   :  { %v355_v2 = vadd.f32 %v353_v0, %v1371_v63 }
 0x1f5   :  { %v361_v3 = vsel %vm360_vm5, %v355_v2, -inf }
 0x1f6   :  { %362 = vmax.xlane.f32.xlu0 %v361_v3 }
 0x27f   :  { %v359_v4 = vpop.xlane.xlu1 %358 }
 0x280   :  { %v364_v7 = vsub.f32 %v354_v61, %v359_v4 }
 0x282   :  { %v366_v9 = vmul.f32 1.442695, %v364_v7 }
 0x283   :  { %v363_v13 = vpop.xlane.xlu0 %362 }
 0x284   :  { %1146 = vpow2.f32 %v366_v9  ;;  %v365_v14 = vsub.f32 %v355_v2, %v363_v13 }
 0x286   :  { %v368_v15 = vmul.f32 1.442695, %v365_v14 }
 0x288   :  { %1148 = vpow2.f32 %v368_v15 }
 0x28e   :  { %v1147_v16 = vpop.eup %1146 }
 0x28f   :  { %v370_v17 = vsel %vm356_vm4, %v1147_v16, 0.0 }
 0x290   :  { %371 = vadd.xlane.f32.xlu1 %v370_v17 }
 0x292   :  { %v1149_v18 = vpop.eup %1148 }
 0x293   :  { %v373_v19 = vsel %vm360_vm5, %v1149_v18, 0.0 }
 0x294   :  { %374 = vadd.xlane.f32.xlu1 %v373_v19 }
 0x2a5   :  { %568 = vrot.lane.b32.xlu1 %v566_v30, %s1209_s14  ;;  %s630_s14 = smul.f32 0.6, %s1432_s3 }
 0x2a7   :  { %v631_v23 = vstv %s630_s14 }
 0x31d   :  { %v372_v20 = vpop.xlane.xlu1 %371 }
 0x31e   :  { %1150 = vrcp.f32 %v372_v20 }
 0x321   :  { %v375_v21 = vpop.xlane.xlu1 %374 }
 0x322   :  { %1152 = vrcp.f32 %v375_v21 }
 0x325   :  { %v569_v41 = vpop.permute.xlu1 %568 }
 0x328   :  { %v1151_v22 = vpop.eup %1150 }
 0x329   :  { %v378_v24 = vmul.f32 %v1151_v22, %v1147_v16  ;;  %v625_v22 = vstv %s606_s6 }
 0x32b   :  { %1080 = vmatprep.mubr.msk.f32.mxu1 %vm356_vm4, %v378_v24  ;;  %v656_v24 = vstv %s639_s1 }
 0x32c   :  { %v1153_v25 = vpop.eup %1152 }
 0x32d   :  { %v379_v26 = vmul.f32 %v1153_v25, %v1149_v18 }
 0x32f   :  { %1081 = vmatmul.mubr.msk.f32.vlgmr.msra.gmra.mrb[0].mxu1 %vm356_vm4, %v379_v26 }
 0x402   :  { %v1082_v34 = vpop.f32.mrb[0].mxu1 }
 0x403   :  { %v466_v35 = vadd.f32 %v1082_v34, %v383_v31  ;;  %v460_v36 = vpop.f32.mrb[1].mxu1 }
 0x404   :  { %v461_v37 = vadd.f32 %v460_v36, %v383_v31 }
 0x405   :  { %v470_v39 = vmax.f32 %v466_v35, 0.0 }
 0x406   :  { %v469_v38 = vmax.f32 %v461_v37, 0.0 }
 0x408   :  { %1085 = vmatprep.mubr.msk.f32.mxu0 %vm472_vm6, %v469_v38 }
 0x409   :  { %1086 = vmatmul.mubr.msk.f32.vlgmr.msra.gmra.mrb[2].mxu0 %vm472_vm6, %v470_v39 }
 0x4dc   :  { %v1087_v29 = vpop.f32.mrb[2].mxu0 }
 0x4dd   :  { %v562_v44 = vadd.f32 %v1087_v29, %v560_v40  ;;  %v572_v45 = vadd.f32 %v1087_v29, %v569_v41  ;;  %v548_v46 = vpop.f32.mrb[3].mxu0 }
 0x4de   :  { %v561_v47 = vadd.f32 %v560_v40, %v548_v46  ;;  %v571_v53 = vadd.f32 %v569_v41, %v548_v46  ;;  %v698_v41 = vstv %s681_s15 }
 0x4df   :  { %v753_v48 = vmul.f32 %v1402_v42, %v572_v45  ;;  %v669_v49 = vmul.f32 %v1404_v43, %v572_v45  ;;  %v711_v54 = vmul.f32 %v1409_v51, %v572_v45  ;;  %v635_v60 = vmul.f32 %v631_v23, %v572_v45 }
 0x4e0   :  { %v1110_v50 = vpack.c.bf16 %v562_v44, %v561_v47  ;;  %v668_v56 = vmul.f32 %v1404_v43, %v571_v53  ;;  %v710_v57 = vmul.f32 %v1409_v51, %v571_v53  ;;  %v752_v52 = vmul.f32 %v1402_v42, %v571_v53 }
 0x4e1   :  { %758 = vrot.lane.b32.xlu0 %v753_v48, %s1215_s21  ;;  %674 = vrot.lane.b32.xlu1 %v669_v49, %s1213_s19  ;;  %v634_v3 = vmul.f32 %v631_v23, %v571_v53 }
 0x4e2   :  { %1112 = vmatprep.subr.msk.bf16.mxu1 %vm1310_vm3, %v1110_v50 }
 0x4e3   :  { %1115 = vmatpush3.bf16.msk.msra.mxu1 %vm1310_vm3, %v1110_v50 }
 0x4e5   :  { %687 = vperm.xlu0 %1142, %v572_v45   ;;  %716 = vrot.lane.b32.xlu1 %v711_v54, %s1214_s20  ;;  %v740_v54 = vstv %s723_s16 }
 0x4e9   :  { %672 = vrot.lane.b32.xlu1 %v668_v56, %s1213_s19  ;;  %1144 = vset.pattern.permute.xlu0 %v1210_v10  ;;  %s1050_s19 = sld [smem:[#allocation2 + $0x9]] }
 0x4ed   :  { %714 = vrot.lane.b32.xlu1 %v710_v57, %s1214_s20 }
 0x4f1   :  { %756 = vrot.lane.b32.xlu1 %v752_v52, %s1215_s21  ;;  %s1218_s21 = smov [#allocation5]  }
 0x4f2   :  { %s1014_s22 = sshll.u32 %s1218_s21, 4  ;;  %s1015_s22 = int_to_ptr.vmem [resolvable:$true] %s1014_s22 }
 0x4f3   :  { %s1182_s23 = scalar_lea.vmem %s1015_s22, 256  ;;  %p1187_p6 = scmp.lt.s32.totalorder %s1015_s22, %s1015_s22 }
 0x4f4   :  { %p1183_p5 = scmp.ne.s32.totalorder %s1015_s22, %s1182_s23  ;;  %p1188_p7 = scmp.lt.s32.totalorder %s1182_s23, %s1182_s23 }
 0x4f5   :  { %609 = vperm.xlu1 %1137, %v571_v53  }
 0x4f6   :  { %p1189_p8 = por %p1188_p7, %p1187_p6 }
 0x4f8   :  { %p1190_p9 = pnand %p1189_p8, %p1183_p5 }
 0x4f9   :  { %1138 = vset.pattern.permute.xlu1 %v1211_v11 }
 0x4fa   :  { %641 = vperm.xlu1 %1138, %v571_v53  }
 0x4fe   :  { %1139 = vset.pattern.permute.xlu1 %v1210_v10 }
 0x4ff   :  { %614 = vperm.xlu1 %1139, %v572_v45  }
 0x503   :  { %1140 = vset.pattern.permute.xlu1 %v1211_v11 }
 0x504   :  { %645 = vperm.xlu1 %1140, %v572_v45  }
 0x508   :  { %1141 = vset.pattern.permute.xlu1 %v1216_v32 }
 0x509   :  { %683 = vperm.xlu1 %1141, %v571_v53  }
 0x50d   :  { %1143 = vset.pattern.permute.xlu1 %v1217_v33 }
 0x50e   :  { %725 = vperm.xlu1 %1143, %v571_v53  }
 0x512   :  { %729 = vperm.xlu1 %1143, %v572_v45  }
 0x516   :  { %1145 = vset.pattern.permute.xlu1 %v1210_v10 }
 0x553   :  { %v675_v59 = vpop.permute.xlu1 %674  ;;  %v759_v1 = vpop.permute.xlu0 %758 }
 0x554   :  { %v679_v61 = vadd.f32 %v675_v59, %v635_v60 }
 0x557   :  { %v717_v0 = vpop.permute.xlu1 %716 }
 0x558   :  { %v721_v11 = vadd.f32 %v717_v0, %v679_v61 }
 0x55a   :  { %v763_v2 = vadd.f32 %v759_v1, %v721_v11 }
 0x55b   :  { %v673_v32 = vpop.permute.xlu1 %672 }
 0x55c   :  { %771 = vperm.xlu1 %1145, %v763_v2   ;;  %v678_v4 = vadd.f32 %v673_v32, %v634_v3 }
 0x55f   :  { %v715_v33 = vpop.permute.xlu1 %714 }
 0x560   :  { %v720_v10 = vadd.f32 %v715_v33, %v678_v4 }
 0x563   :  { %v757_v7 = vpop.permute.xlu1 %756 }
 0x564   :  { %v762_v9 = vadd.f32 %v757_v7, %v720_v10 }
 0x566   :  { %766 = vperm.xlu0 %1144, %v762_v9  }
 0x574   :  { %v610_v13 = vpop.permute.xlu1 %609 }
 0x579   :  { %v642_v14 = vpop.permute.xlu1 %641 }
 0x57e   :  { %v615_v15 = vpop.permute.xlu1 %614 }
 0x583   :  { %v646_v16 = vpop.permute.xlu1 %645 }
 0x585   :  { %573 = vxpose.xlu1.b32.start [1/2] (short) (narrow) %v561_v47, 8 }
 0x588   :  { %v684_v17 = vpop.permute.xlu1 %683 }
 0x589   :  { %574 = vxpose.xlu1.b32.end [2/2] (short) (narrow) %v562_v44, 8 }
 0x58d   :  { %v726_v18 = vpop.permute.xlu1 %725 }
 0x591   :  { %v730_v19 = vpop.permute.xlu1 %729 }
 0x5db   :  { %v772_v20 = vpop.permute.xlu1 %771 }
 0x605   :  { %v589_v21 = vpop.trf.xlu1 }
 0x606   :  { %v620_v25 = vrot.slane %v589_v21, %v1298_v12  ;;  %v632_v26 = vmul.f32 %v631_v23, %v589_v21  ;;  %v651_v27 = vrot.slane %v589_v21, %v1285_v8  ;;  %v663_v28 = vmul.f32 %v1404_v43, %v589_v21  ;;  %v688_v8 = vpop.permute.xlu0 %687 }
 0x607   :  { %v693_v30 = vrot.slane %v589_v21, %v1347_v58  ;;  %v705_v31 = vmul.f32 %v1409_v51, %v589_v21  ;;  %v735_v34 = vrot.slane %v589_v21, %v1353_v62  ;;  %v747_v35 = vmul.f32 %v1402_v42, %v589_v21 }
 0x608   :  { %v665_v36 = vrot.slane %v663_v28, 1  ;;  %v621_v37 = vadd.f32 %v620_v25, %v610_v13  ;;  %v652_v38 = vadd.f32 %v651_v27, %v642_v14  ;;  %v622_v39 = vadd.f32 %v620_v25, %v615_v15 }
 0x609   :  { %v694_v40 = vadd.f32 %v693_v30, %v684_v17  ;;  %v707_v29 = vrot.slane %v705_v31, 2  ;;  %v736_v44 = vadd.f32 %v735_v34, %v726_v18  ;;  %v749_v48 = vrot.slane %v747_v35, 3 }
 0x60a   :  { %v623_v45 = vand.u32 2147483647, %v621_v37  ;;  %v654_v43 = vand.u32 2147483647, %v652_v38  ;;  %v667_v46 = vadd.f32 %v665_v36, %v632_v26  ;;  %v624_v58 = vand.u32 2147483647, %v622_v39  ;;  %v767_v3 = vpop.permute.xlu0 %766 }
 0x60b   :  { %v696_v47 = vand.u32 2147483647, %v694_v40  ;;  %v653_v49 = vadd.f32 %v651_v27, %v646_v16  ;;  %v695_v62 = vadd.f32 %v693_v30, %v688_v8  ;;  %v738_v53 = vand.u32 2147483647, %v736_v44  ;;  %v896_v39 = vld [vmem:[%s1484_s5] sm:$0xf] }
 0x60c   :  { %v626_v50 = vmul.f32 %v625_v22, %v623_v45  ;;  %v657_v42 = vmul.f32 %v656_v24, %v654_v43  ;;  %v709_v51 = vadd.f32 %v707_v29, %v667_v46  ;;  %v627_v56 = vmul.f32 %v625_v22, %v624_v58  ;;  %1095 = vmatprep.subr.msk.mxu0 %vm390_vm1, %v896_v39  ;;  %s1049_s5 = sld [smem:[#allocation2 + $0x8]] }
 0x60d   :  { %v655_v57 = vand.u32 2147483647, %v653_v49  ;;  %v697_v52 = vand.u32 2147483647, %v695_v62  ;;  %v699_v59 = vmul.f32 %v698_v41, %v696_v47  ;;  %v737_v61 = vadd.f32 %v735_v34, %v730_v19  ;;  %1096 = vmatpush3.msk.msra.mxu0 %vm390_vm1, %v896_v39 }
 0x60e   :  { %v659_v23 = vadd.f32 %v657_v42, %v626_v50  ;;  %v751_v60 = vadd.f32 %v749_v48, %v709_v51  ;;  %v741_v1 = vmul.f32 %v740_v54, %v738_v53  ;;  %v808_v40 = vsub.s32 5, %v1274_v5 }
 0x60f   :  { %v658_v0 = vmul.f32 %v656_v24, %v655_v57  ;;  %v739_v32 = vand.u32 2147483647, %v737_v61  ;;  %v700_v4 = vmul.f32 %v698_v41, %v697_v52  ;;  %v899_v58 = vsub.s32 6, %v1274_v5 }
 0x610   :  { %v701_v11 = vadd.f32 %v699_v59, %v659_v23  ;;  %v777_v2 = vrot.slane %v751_v60, %v1298_v12  ;;  %v809_v41 = vrot.slane %v1279_v6, %v808_v40 }
 0x611   :  { %v660_v33 = vadd.f32 %v658_v0, %v627_v56  ;;  %v742_v13 = vmul.f32 %v740_v54, %v739_v32  ;;  %v900_v47 = vrot.slane %v1279_v6, %v899_v58 }
 0x612   :  { %v743_v10 = vadd.f32 %v741_v1, %v701_v11  ;;  %v778_v7 = vadd.f32 %v777_v2, %v767_v3  ;;  %v779_v14 = vadd.f32 %v777_v2, %v772_v20  ;;  %s999_s20 = ssub.f32 %s1050_s19, %s1049_s5  ;;  %v1003_v6 = vstv %s1049_s5 }
 0x613   :  { %v702_v9 = vadd.f32 %v700_v4, %v660_v33 }
 0x614   :  { %v780_v15 = vadd.f32 %v778_v7, %v743_v10  ;;  %v1000_v5 = vstv %s999_s20 }
 0x615   :  { %v744_v16 = vadd.f32 %v742_v13, %v702_v9 }
 0x616   :  { %v782_v17 = vadd.f32 %v780_v15, %v1365_v55 }
 0x617   :  { %v781_v18 = vadd.f32 %v779_v14, %v744_v16 }
 0x618   :  { %v784_v19 = vsel %vm356_vm4, %v782_v17, -inf }
 0x619   :  { %785 = vmax.xlane.f32.xlu0 %v784_v19  ;;  %v783_v21 = vadd.f32 %v781_v18, %v1371_v63 }
 0x61b   :  { %v787_v12 = vsel %vm360_vm5, %v783_v21, -inf }
 0x61d   :  { %788 = vmax.xlane.f32.xlu0 %v787_v12 }
 0x6a6   :  { %v786_v22 = vpop.xlane.xlu0 %785 }
 0x6a7   :  { %v790_v24 = vsub.f32 %v782_v17, %v786_v22 }
 0x6a9   :  { %v792_v25 = vmul.f32 1.442695, %v790_v24 }
 0x6aa   :  { %v789_v26 = vpop.xlane.xlu0 %788 }
 0x6ab   :  { %1154 = vpow2.f32 %v792_v25  ;;  %v791_v27 = vsub.f32 %v783_v21, %v789_v26 }
 0x6ad   :  { %v794_v20 = vmul.f32 1.442695, %v791_v27 }
 0x6af   :  { %1156 = vpow2.f32 %v794_v20 }
 0x6b5   :  { %v1155_v28 = vpop.eup %1154 }
 0x6b6   :  { %v796_v55 = vsel %vm356_vm4, %v1155_v28, 0.0 }
 0x6b7   :  { %797 = vadd.xlane.f32.xlu0 %v796_v55 }
 0x6b9   :  { %v1157_v30 = vpop.eup %1156 }
 0x6ba   :  { %v799_v31 = vsel %vm360_vm5, %v1157_v30, 0.0 }
 0x6bb   :  { %800 = vadd.xlane.f32.xlu0 %v799_v31 }
 0x744   :  { %v798_v63 = vpop.xlane.xlu0 %797 }
 0x745   :  { %1158 = vrcp.f32 %v798_v63 }
 0x748   :  { %v801_v34 = vpop.xlane.xlu0 %800 }
 0x749   :  { %1160 = vrcp.f32 %v801_v34 }
 0x74f   :  { %v1159_v35 = vpop.eup %1158 }
 0x750   :  { %v804_v36 = vmul.f32 %v1159_v35, %v1155_v28 }
 0x752   :  { %1092 = vmatprep.mubr.msk.f32.mxu1 %vm356_vm4, %v804_v36 }
 0x753   :  { %v1161_v37 = vpop.eup %1160 }
 0x754   :  { %v805_v38 = vmul.f32 %v1161_v37, %v1157_v30 }
 0x756   :  { %1093 = vmatmul.mubr.msk.f32.vlgmr.msra.gmra.mrb[2].mxu1 %vm356_vm4, %v805_v38 }
 0x829   :  { %v1094_v29 = vpop.f32.mrb[2].mxu1 }
 0x82a   :  { %v891_v44 = vadd.f32 %v1094_v29, %v809_v41  ;;  %v885_v8 = vpop.f32.mrb[3].mxu1 }
 0x82b   :  { %v886_v45 = vadd.f32 %v885_v8, %v809_v41 }
 0x82c   :  { %v895_v46 = vmax.f32 %v891_v44, 0.0 }
 0x82d   :  { %v894_v43 = vmax.f32 %v886_v45, 0.0 }
 0x82f   :  { %1097 = vmatprep.mubr.msk.f32.mxu0 %vm472_vm6, %v894_v43 }
 0x830   :  { %1098 = vmatmul.mubr.msk.f32.vlgmr.msra.gmra.mrb[4].mxu0 %vm472_vm6, %v895_v46 }
 0x903   :  { %v1099_v48 = vpop.f32.mrb[4].mxu0 }
 0x904   :  { %v982_v49 = vadd.f32 %v1099_v48, %v900_v47  ;;  %v976_v62 = vpop.f32.mrb[5].mxu0 }
 0x905   :  { %v977_v50 = vadd.f32 %v976_v62, %v900_v47 }
 0x906   :  { %v1048_v42 = vmul.f32 -1.442695, %v982_v49 }
 0x907   :  { %v1047_v51 = vmul.f32 -1.442695, %v977_v50 }
 0x908   :  { %1162 = vpow2.f32 %v1048_v42 }
 0x909   :  { %1164 = vpow2.f32 %v1047_v51 }
 0x912   :  { %v1163_v53 = vpop.eup %1162 }
 0x913   :  { %v1165_v54 = vpop.eup %1164  ;;  %v992_v56 = vadd.f32 1.0, %v1163_v53 }
 0x914   :  { %v991_v57 = vadd.f32 1.0, %v1165_v54 }
 0x915   :  { %1166 = vrcp.f32 %v992_v56 }
 0x916   :  { %1168 = vrcp.f32 %v991_v57 }
 0x91f   :  { %v1167_v52 = vpop.eup %1166 }
 0x920   :  { %v1169_v23 = vpop.eup %1168  ;;  %v1002_v59 = vmul.f32 %v1167_v52, %v1000_v5 }
 0x921   :  { %v1001_v60 = vmul.f32 %v1169_v23, %v1000_v5 }
 0x922   :  { %v1005_v61 = vadd.f32 %v1003_v6, %v1002_v59 }
 0x923   :  { %v1004_v0 = vadd.f32 %v1003_v6, %v1001_v60 }
 0x924   :  { %1008 = vst.msk [vmem:[#allocation5 + $0x8] sm:$0xf] %vm1007_vm7, %v1005_v61 }
 0x925   :  { %1006 = vst.msk [vmem:[#allocation5] sm:$0xff] %vm47_vm0, %v1004_v0 }
 0x926   :  { %1193 = shalt.err (!%p1190_p9)
}
 0x927   :  { %s1194_s26 = scalar_lea.hbm %s1486_s7, 256 }
 0x928   :  { %p1195_p10 = scmp.ne.s32.totalorder %s1486_s7, %s1194_s26  ;;  %p1198_p11 = scmp.lt.u32.totalorder %s1194_s26, %s1486_s7 }
 0x92a   :  { %p1200_p12 = pnand %p1198_p11, %p1195_p10 }
 0x92c   :  { %1203 = shalt.err (!%p1200_p12)
}
 0x92d   :  { %s1219_s8 = smov 128   ;;  %s1220_s2 = smov 8  }
 0x92e   :  { %1020 = dma.vmem_to_hbm [thread:$0]  %s1015_s22, 256, %s1486_s7, [#allocation3], %s1219_s8, %s1219_s8, %s1220_s2  }
 0x92f   :  { %1206 = dma.done.wait [#allocation3], 256  }
 0x930   :  { %1207 = vsyncadd [#allocation3], 4294967040 }
 0x931   :  { %1024 = vsyncpa [#allocation3], 1 }
 0x932   :  { %1025 = vsyncpa [#allocation4], 1 }

</bundles_post_ra>
